<compile_context>
chip_gen: v7x
topology: tpu7x:2x2x1
jax: 0.10.0
libtpu: 0.0.40
codegen_flags: <defaults>
</compile_context>

<pallas_src>
import jax
import jax.numpy as jnp
from jax.experimental import pallas as pl
from jax.experimental.pallas import tpu as pltpu


def _round_up(x, m):
    return ((x + m - 1) // m) * m


def mobilenetv3_head_kernel(x_ref, w1_ref, b1_ref, w2_ref, b2_ref, out_ref):
    # x_ref: (TN, C, HW) -- native NCHW layout flattened over spatial.
    hw = x_ref.shape[2]

    # AdaptiveAvgPool2d((1,1)) == mean over the spatial (lane) axis,
    # accumulated in f32 regardless of the streamed dtype.
    pooled = jnp.sum(x_ref[...].astype(jnp.float32), axis=2) * (1.0 / hw)  # (TN, C)

    # conv1: 1x1 conv on a 1x1 feature map == dense layer.  MXU operands in
    # the weight dtype (bf16 runs at full MXU rate); accumulate in f32.
    h = jnp.dot(pooled.astype(w1_ref.dtype), w1_ref[...],
                preferred_element_type=jnp.float32)
    h = h + b1_ref[...].astype(jnp.float32)                                # (TN, inner)

    # Hardswish: x * relu6(x + 3) / 6  (f32 intermediate).
    h = h * jnp.clip(h + 3.0, 0.0, 6.0) * (1.0 / 6.0)

    # Dropout(p=0.0) is identity in this configuration.
    # TODO(synk): non-zero dropout_rate (training mode) would need
    # pltpu.prng_seed / pltpu.prng_random_bits inside the kernel.

    # conv2: 1x1 conv == dense layer.
    out = jnp.dot(h.astype(w2_ref.dtype), w2_ref[...],
                  preferred_element_type=jnp.float32)
    out_ref[...] = (out + b2_ref[...].astype(jnp.float32)).astype(out_ref.dtype)


def mobilenetv3_head(x_nchw, w1, b1, w2, b2, *, max_batch_tile=128):
    """MobileNetV3Head forward.

    x_nchw: (N, C, H, W); w1: (C, inner); b1: (1, inner);
    w2: (inner, num_classes); b2: (1, num_classes) -> (N, num_classes).
    """
    N, C, H, W = x_nchw.shape
    inner = w1.shape[1]
    num_classes = w2.shape[1]
    HW = H * W
    itemsize = x_nchw.dtype.itemsize

    # NCHW -> (N, C, H*W) is a free (contiguous) reshape; no HBM transpose.
    x = x_nchw.reshape(N, C, HW)

    # Per-batch-row VMEM footprint of one x block, including (8,128) padding.
    c_pad = _round_up(C, 8)
    hw_pad = _round_up(HW, 128)
    row_bytes = c_pad * hw_pad * itemsize

    # Batch tile: multiple of 8 sublanes, keep the double-buffered x stream
    # within ~16 MiB of VMEM, never larger than the (sublane-padded) batch.
    x_budget = 16 << 20
    tn_fit = (x_budget // (2 * row_bytes)) // 8 * 8
    tn = max(8, min(max_batch_tile, max(tn_fit, 8)))
    tn = min(tn, _round_up(N, 8))
    n_pad = _round_up(N, tn)
    if n_pad != N:
        x = jnp.pad(x, ((0, n_pad - N), (0, 0), (0, 0)))

    grid = (n_pad // tn,)

    # VMEM budget: double-buffered x / out tiles + weights (resident, but
    # Pallas still allocates two buffers per input), with headroom, capped
    # below v7x's 64 MiB physical VMEM so the same code runs on v5e/v6e/v7x.
    inner_lane = _round_up(inner, 128)
    nc_lane = _round_up(num_classes, 128)
    w_bytes = ((c_pad * inner_lane + _round_up(inner, 8) * nc_lane) * w1.dtype.itemsize
               + 8 * (inner_lane + nc_lane) * b1.dtype.itemsize)
    out_tile_bytes = tn * nc_lane * itemsize
    vmem_needed = 2 * (tn * row_bytes + out_tile_bytes + w_bytes)
    vmem_limit = int(min(max(int(1.5 * vmem_needed), 16 << 20), 56 << 20))

    cost = pl.CostEstimate(
        flops=2 * n_pad * (C * inner + inner * num_classes),
        transcendentals=0,
        bytes_accessed=(n_pad * C * HW * itemsize
                        + (C * inner + inner * num_classes) * w1.dtype.itemsize
                        + (inner + num_classes) * b1.dtype.itemsize
                        + n_pad * num_classes * itemsize),
    )

    out = pl.pallas_call(
        mobilenetv3_head_kernel,
        out_shape=jax.ShapeDtypeStruct((n_pad, num_classes), x_nchw.dtype),
        grid=grid,
        in_specs=[
            pl.BlockSpec((tn, C, HW), lambda i: (i, 0, 0)),       # streamed per tile
            pl.BlockSpec((C, inner), lambda i: (0, 0)),           # weights: resident
            pl.BlockSpec((1, inner), lambda i: (0, 0)),
            pl.BlockSpec((inner, num_classes), lambda i: (0, 0)),
            pl.BlockSpec((1, num_classes), lambda i: (0, 0)),
        ],
        out_specs=pl.BlockSpec((tn, num_classes), lambda i: (i, 0)),
        compiler_params=pltpu.CompilerParams(
            dimension_semantics=("parallel",),
            vmem_limit_bytes=vmem_limit,
        ),
        cost_estimate=cost,
    )(x, w1, b1, w2, b2)

    return out[:N]


def init_params(key, feature_dims, inner_dims, num_classes, dtype=jnp.float32):
    """Kaiming normal (fan_out, relu gain) for 1x1 conv weights; zero biases."""
    k1, k2 = jax.random.split(key)
    # conv1 weight in PyTorch: (inner, feature, 1, 1); fan_out = inner
    std1 = (2.0 / inner_dims) ** 0.5
    w1 = jax.random.normal(k1, (feature_dims, inner_dims), dtype) * std1
    b1 = jnp.zeros((1, inner_dims), dtype)
    # conv2 weight: (num_classes, inner, 1, 1); fan_out = num_classes
    std2 = (2.0 / num_classes) ** 0.5
    w2 = jax.random.normal(k2, (inner_dims, num_classes), dtype) * std2
    b2 = jnp.zeros((1, num_classes), dtype)
    return w1, b1, w2, b2


if __name__ == "__main__":
    # Small shapes consistent with the module's forward (scaled-down dims).
    N, C, H, W = 2, 32, 8, 8          # batch, feature_dims, spatial
    INNER, NUM_CLASSES = 128, 16

    key = jax.random.PRNGKey(0)
    kx, kp = jax.random.split(key)
    x = jax.random.normal(kx, (N, C, H, W), jnp.float32)
    w1, b1, w2, b2 = init_params(kp, C, INNER, NUM_CLASSES)

    out = mobilenetv3_head(x, w1, b1, w2, b2)
    out = jax.block_until_ready(out)

    # Reference check in plain JAX (same math).
    pooled = jnp.mean(x, axis=(2, 3))
    h = pooled @ w1 + b1
    h = h * jnp.clip(h + 3.0, 0.0, 6.0) / 6.0
    ref = h @ w2 + b2
    assert out.shape == (N, NUM_CLASSES)
    assert jnp.allclose(out, ref, atol=1e-4, rtol=1e-4)

    # bf16 streaming path (halves HBM traffic; f32 accumulation in-kernel).
    out_bf16 = mobilenetv3_head(
        x.astype(jnp.bfloat16), w1.astype(jnp.bfloat16), b1.astype(jnp.bfloat16),
        w2.astype(jnp.bfloat16), b2.astype(jnp.bfloat16))
    out_bf16 = jax.block_until_ready(out_bf16)
    assert out_bf16.shape == (N, NUM_CLASSES)
    assert jnp.allclose(out_bf16.astype(jnp.float32), ref, atol=5e-2, rtol=1e-1)

    print("KERNEL_OK")
</pallas_src>

<mosaic_0001>
module attributes {stable_mosaic.version = 11 : i64} {
  func.func @mobilenetv3_head_kernel(%arg0: i32, %arg1: memref<8x32x64xf32, #tpu.memory_space<vmem>>, %arg2: memref<32x128xf32, #tpu.memory_space<vmem>>, %arg3: memref<1x128xf32, #tpu.memory_space<vmem>>, %arg4: memref<128x16xf32, #tpu.memory_space<vmem>>, %arg5: memref<1x16xf32, #tpu.memory_space<vmem>>, %arg6: memref<8x16xf32, #tpu.memory_space<vmem>>) attributes {dimension_semantics = [#tpu.dimension_semantics<parallel>], iteration_bounds = array<i64: 1>, scalar_prefetch = 0 : i64, scratch_operands = 0 : i64, tpu.core_type = #tpu.core_type<tc>, window_params = [{transform_indices = @transform_0, window_bounds = array<i64: 8, 32, 64>}, {pipeline_mode = #tpu.pipeline_mode<synchronous>, transform_indices = @transform_1, window_bounds = array<i64: 32, 128>}, {pipeline_mode = #tpu.pipeline_mode<synchronous>, transform_indices = @transform_2, window_bounds = array<i64: 1, 128>}, {pipeline_mode = #tpu.pipeline_mode<synchronous>, transform_indices = @transform_3, window_bounds = array<i64: 128, 16>}, {pipeline_mode = #tpu.pipeline_mode<synchronous>, transform_indices = @transform_4, window_bounds = array<i64: 1, 16>}, {transform_indices = @transform_5, window_bounds = array<i64: 8, 16>}]} {
    %c0 = arith.constant 0 : index
    %c0_0 = arith.constant 0 : index
    %c0_1 = arith.constant 0 : index
    %0 = vector.load %arg1[%c0, %c0_0, %c0_1] : memref<8x32x64xf32, #tpu.memory_space<vmem>>, vector<8x32x64xf32>
    %cst = arith.constant dense<0.000000e+00> : vector<8x32xf32>
    %1 = vector.multi_reduction <add>, %0, %cst [2] : vector<8x32x64xf32> to vector<8x32xf32>
    %cst_2 = arith.constant 1.562500e-02 : f32
    %2 = vector.broadcast %cst_2 : f32 to vector<8x32xf32>
    %3 = arith.mulf %1, %2 : vector<8x32xf32>
    %c0_3 = arith.constant 0 : index
    %c0_4 = arith.constant 0 : index
    %4 = vector.load %arg2[%c0_3, %c0_4] : memref<32x128xf32, #tpu.memory_space<vmem>>, vector<32x128xf32>
    %cst_5 = arith.constant dense<0.000000e+00> : vector<8x128xf32>
    %5 = tpu.matmul %3, %4, %cst_5 {dimension_numbers = #tpu.dot_dimension_numbers<[1], [0], [0], [1], [0, 0, 1, 1], [], []>} : vector<8x32xf32>, vector<32x128xf32>, vector<8x128xf32> -> vector<8x128xf32>
    %c0_6 = arith.constant 0 : index
    %c0_7 = arith.constant 0 : index
    %6 = vector.load %arg3[%c0_6, %c0_7] : memref<1x128xf32, #tpu.memory_space<vmem>>, vector<1x128xf32>
    %7 = vector.broadcast %6 : vector<1x128xf32> to vector<8x128xf32>
    %8 = arith.addf %5, %7 : vector<8x128xf32>
    %cst_8 = arith.constant 3.000000e+00 : f32
    %9 = vector.broadcast %cst_8 : f32 to vector<8x128xf32>
    %10 = arith.addf %8, %9 : vector<8x128xf32>
    %cst_9 = arith.constant 0.000000e+00 : f32
    %cst_10 = arith.constant 6.000000e+00 : f32
    %11 = vector.broadcast %cst_9 : f32 to vector<8x128xf32>
    %12 = arith.maximumf %11, %10 : vector<8x128xf32>
    %13 = vector.broadcast %cst_10 : f32 to vector<8x128xf32>
    %14 = arith.minimumf %13, %12 : vector<8x128xf32>
    %15 = arith.mulf %8, %14 : vector<8x128xf32>
    %cst_11 = arith.constant 0.166666672 : f32
    %16 = vector.broadcast %cst_11 : f32 to vector<8x128xf32>
    %17 = arith.mulf %15, %16 : vector<8x128xf32>
    %c0_12 = arith.constant 0 : index
    %c0_13 = arith.constant 0 : index
    %18 = vector.load %arg4[%c0_12, %c0_13] : memref<128x16xf32, #tpu.memory_space<vmem>>, vector<128x16xf32>
    %cst_14 = arith.constant dense<0.000000e+00> : vector<8x16xf32>
    %19 = tpu.matmul %17, %18, %cst_14 {dimension_numbers = #tpu.dot_dimension_numbers<[1], [0], [0], [1], [0, 0, 1, 1], [], []>} : vector<8x128xf32>, vector<128x16xf32>, vector<8x16xf32> -> vector<8x16xf32>
    %c0_15 = arith.constant 0 : index
    %c0_16 = arith.constant 0 : index
    %20 = vector.load %arg5[%c0_15, %c0_16] : memref<1x16xf32, #tpu.memory_space<vmem>>, vector<1x16xf32>
    %21 = vector.broadcast %20 : vector<1x16xf32> to vector<8x16xf32>
    %22 = arith.addf %19, %21 : vector<8x16xf32>
    %c0_17 = arith.constant 0 : index
    %c0_18 = arith.constant 0 : index
    %23 = vector.load %arg6[%c0_17, %c0_18] : memref<8x16xf32, #tpu.memory_space<vmem>>, vector<8x16xf32>
    tpu.vector_store %arg6[%c0_17, %c0_18], %22 {strides = array<i32>} : memref<8x16xf32, #tpu.memory_space<vmem>>, vector<8x16xf32>,
    return
  }
  func.func @transform_0(%arg0: i32) -> (i32, i32, i32) {
    %c0_i32 = arith.constant 0 : i32
    %c0_i32_0 = arith.constant 0 : i32
    %c0_i32_1 = arith.constant 0 : i32
    return %arg0, %c0_i32, %c0_i32_0 : i32, i32, i32
  }
  func.func @transform_1(%arg0: i32) -> (i32, i32) {
    %c0_i32 = arith.constant 0 : i32
    %c0_i32_0 = arith.constant 0 : i32
    %c0_i32_1 = arith.constant 0 : i32
    return %c0_i32, %c0_i32_0 : i32, i32
  }
  func.func @transform_2(%arg0: i32) -> (i32, i32) {
    %c0_i32 = arith.constant 0 : i32
    %c0_i32_0 = arith.constant 0 : i32
    %c0_i32_1 = arith.constant 0 : i32
    return %c0_i32, %c0_i32_0 : i32, i32
  }
  func.func @transform_3(%arg0: i32) -> (i32, i32) {
    %c0_i32 = arith.constant 0 : i32
    %c0_i32_0 = arith.constant 0 : i32
    %c0_i32_1 = arith.constant 0 : i32
    return %c0_i32, %c0_i32_0 : i32, i32
  }
  func.func @transform_4(%arg0: i32) -> (i32, i32) {
    %c0_i32 = arith.constant 0 : i32
    %c0_i32_0 = arith.constant 0 : i32
    %c0_i32_1 = arith.constant 0 : i32
    return %c0_i32, %c0_i32_0 : i32, i32
  }
  func.func @transform_5(%arg0: i32) -> (i32, i32) {
    %c0_i32 = arith.constant 0 : i32
    %c0_i32_0 = arith.constant 0 : i32
    return %arg0, %c0_i32 : i32, i32
  }
}

</mosaic_0001>

<bundles_post_ra>
// kernel: tpu_custom_call.1
= control target key start
LH: loop header
LB: loop body
LE: loop exit
PB: predicated region body
PF: predicated region fallthrough
CT: control target
= control target key end

     0   :  { %10 = vsyncpa [#allocation3], 0  ;;  %s1002_s0 = inlined_call_operand.hbm [shape: f32[8,32,64], index: 0, kind: input, shape index: {}]   ;;  %s1003_s1 = inlined_call_operand.vmem [shape: f32[32,128], index: 1, kind: input, shape index: {}]   ;;  %s1004_s2 = inlined_call_operand.vmem [shape: f32[1,128], index: 2, kind: input, shape index: {}]   ;;  %s1005_s3 = inlined_call_operand.vmem [shape: f32[128,16], index: 3, kind: input, shape index: {}]   ;;  %s1006_s4 = inlined_call_operand.vmem [shape: f32[1,16], index: 4, kind: input, shape index: {}]   ;;  %s1007_s5 = inlined_call_operand.hbm [shape: f32[8,16], index: 5, kind: output, shape index: {}]  }
   0x1   :  { %11 = vsyncpa [#allocation4], 0  ;;  %s757_s18 = smov [#allocation2]   ;;  %s709_s22 = scalar_lea.hbm %s1002_s0, 4096 }
   0x2   :  { %s17_s19 = sshll.u32 %s757_s18, 4  ;;  %p710_p0 = scmp.ne.s32.totalorder %s1002_s0, %s709_s22  ;;  %s18_s19 = int_to_ptr.vmem [resolvable:$true] %s17_s19 }
   0x3   :  { %p713_p1 = scmp.lt.u32.totalorder %s709_s22, %s1002_s0 }
   0x5   :  { %p715_p2 = pnand %p713_p1, %p710_p0 }
   0x7   :  { %718 = shalt.err (!%p715_p2)
}
   0x8   :  { %s719_s27 = scalar_lea.vmem %s18_s19, 4096  ;;  %p724_p4 = scmp.lt.s32.totalorder %s18_s19, %s18_s19 }
   0x9   :  { %p720_p3 = scmp.ne.s32.totalorder %s18_s19, %s719_s27  ;;  %p725_p5 = scmp.lt.s32.totalorder %s719_s27, %s719_s27 }
   0xb   :  { %p726_p6 = por %p725_p5, %p724_p4 }
   0xd   :  { %p727_p7 = pnand %p726_p6, %p720_p3 }
   0xf   :  { %730 = shalt.err (!%p727_p7)
}
  0x10   :  { %s758_s28 = smov 128   ;;  %s759_s29 = smov 8  }
  0x11   :  { %23 = dma.hbm_to_vmem [thread:$0]  %s1002_s0, 4096, %s18_s19, [#allocation3], %s758_s28, %s758_s28, %s759_s29  }
  0x12   :  { %753 = dma.done.wait [#allocation3], 4096  }
  0x13   :  { %754 = vsyncadd [#allocation3], 4294963200  ;;  %vm67_vm0 = vcmask 523264   ;;  %v39_v0 = vld [vmem:[#allocation2 + $0x20] sm:$0xff]  ;;  %v40_v2 = vld [vmem:[#allocation2 + $0x28] sm:$0xff]  ;;  %vm761_vm1 = vmmov 0  }
  0x14   :  { %v35_v1 = vld [vmem:[#allocation2] sm:$0xff]  ;;  %v80_v3 = vsel %vm67_vm0, %v39_v0, 0.0  ;;  %v36_v5 = vld [vmem:[#allocation2 + $0x8] sm:$0xff]  ;;  %v83_v6 = vsel %vm67_vm0, %v40_v2, 0.0  ;;  %v41_v8 = vld [vmem:[#allocation2 + $0x30] sm:$0xff]  ;;  %vm250_vm2 = vcmask 130112  }
  0x15   :  { %v68_v4 = vsel %vm67_vm0, %v35_v1, 0.0  ;;  %81 = vadd.xlane.f32.xlu1 %v80_v3  ;;  %v71_v7 = vsel %vm67_vm0, %v36_v5, 0.0  ;;  %v37_v9 = vld [vmem:[#allocation2 + $0x10] sm:$0xff]  ;;  %v86_v10 = vsel %vm67_vm0, %v41_v8, 0.0  ;;  %v44_v12 = vld [vmem:[#allocation2 + $0x48] sm:$0xff]  ;;  %v43_v13 = vld [vmem:[#allocation2 + $0x40] sm:$0xff] }
  0x16   :  { %69 = vadd.xlane.f32.xlu0 %v68_v4  ;;  %v74_v11 = vsel %vm67_vm0, %v37_v9, 0.0  ;;  %v95_v14 = vsel %vm67_vm0, %v44_v12, 0.0  ;;  %v92_v15 = vsel %vm67_vm0, %v43_v13, 0.0  ;;  %v42_v16 = vld [vmem:[#allocation2 + $0x38] sm:$0xff]  ;;  %v47_v20 = vld [vmem:[#allocation2 + $0x60] sm:$0xff]  ;;  %v45_v21 = vld [vmem:[#allocation2 + $0x50] sm:$0xff] }
  0x17   :  { %v38_v17 = vld [vmem:[#allocation2 + $0x18] sm:$0xff]  ;;  %v89_v18 = vsel %vm67_vm0, %v42_v16, 0.0  ;;  %v104_v22 = vsel %vm67_vm0, %v47_v20, 0.0  ;;  %v98_v23 = vsel %vm67_vm0, %v45_v21, 0.0  ;;  %v48_v25 = vld [vmem:[#allocation2 + $0x68] sm:$0xff]  ;;  %v51_v28 = vld [vmem:[#allocation2 + $0x80] sm:$0xff] }
  0x18   :  { %v77_v19 = vsel %vm67_vm0, %v38_v17, 0.0  ;;  %v46_v24 = vld [vmem:[#allocation2 + $0x58] sm:$0xff]  ;;  %v107_v27 = vsel %vm67_vm0, %v48_v25, 0.0  ;;  %v49_v29 = vld [vmem:[#allocation2 + $0x70] sm:$0xff]  ;;  %v116_v30 = vsel %vm67_vm0, %v51_v28, 0.0  ;;  %v52_v33 = vld [vmem:[#allocation2 + $0x88] sm:$0xff] }
  0x19   :  { %84 = vadd.xlane.f32.xlu1 %v83_v6  ;;  %v101_v26 = vsel %vm67_vm0, %v46_v24, 0.0  ;;  %v110_v31 = vsel %vm67_vm0, %v49_v29, 0.0  ;;  %v50_v32 = vld [vmem:[#allocation2 + $0x78] sm:$0xff]  ;;  %v119_v35 = vsel %vm67_vm0, %v52_v33, 0.0  ;;  %v55_v36 = vld [vmem:[#allocation2 + $0xa0] sm:$0xff]  ;;  %v53_v37 = vld [vmem:[#allocation2 + $0x90] sm:$0xff] }
  0x1a   :  { %72 = vadd.xlane.f32.xlu0 %v71_v7  ;;  %v113_v34 = vsel %vm67_vm0, %v50_v32, 0.0  ;;  %v128_v38 = vsel %vm67_vm0, %v55_v36, 0.0  ;;  %v122_v39 = vsel %vm67_vm0, %v53_v37, 0.0  ;;  %v54_v40 = vld [vmem:[#allocation2 + $0x98] sm:$0xff]  ;;  %v56_v41 = vld [vmem:[#allocation2 + $0xa8] sm:$0xff]  ;;  %v59_v44 = vld [vmem:[#allocation2 + $0xc0] sm:$0xff]  ;;  %v239_v37 = vlaneseq }
  0x1b   :  { %v125_v42 = vsel %vm67_vm0, %v54_v40, 0.0  ;;  %v131_v43 = vsel %vm67_vm0, %v56_v41, 0.0  ;;  %v57_v45 = vld [vmem:[#allocation2 + $0xb0] sm:$0xff]  ;;  %v140_v46 = vsel %vm67_vm0, %v59_v44, 0.0  ;;  %v58_v48 = vld [vmem:[#allocation2 + $0xb8] sm:$0xff]  ;;  %v60_v49 = vld [vmem:[#allocation2 + $0xc8] sm:$0xff] }
  0x1c   :  { %v134_v47 = vsel %vm67_vm0, %v57_v45, 0.0  ;;  %v137_v50 = vsel %vm67_vm0, %v58_v48, 0.0  ;;  %v143_v51 = vsel %vm67_vm0, %v60_v49, 0.0  ;;  %v63_v52 = vld [vmem:[#allocation2 + $0xe0] sm:$0xff]  ;;  %v61_v53 = vld [vmem:[#allocation2 + $0xd0] sm:$0xff]  ;;  %v62_v56 = vld [vmem:[#allocation2 + $0xd8] sm:$0xff] }
  0x1d   :  { %87 = vadd.xlane.f32.xlu1 %v86_v10  ;;  %v152_v54 = vsel %vm67_vm0, %v63_v52, 0.0  ;;  %v146_v55 = vsel %vm67_vm0, %v61_v53, 0.0  ;;  %v64_v57 = vld [vmem:[#allocation2 + $0xe8] sm:$0xff]  ;;  %v149_v58 = vsel %vm67_vm0, %v62_v56, 0.0  ;;  %v65_v60 = vld [vmem:[#allocation2 + $0xf0] sm:$0xff]  ;;  %v66_v61 = vld [vmem:[#allocation2 + $0xf8] sm:$0xff] }
  0x1e   :  { %75 = vadd.xlane.f32.xlu0 %v74_v11  ;;  %v155_v59 = vsel %vm67_vm0, %v64_v57, 0.0  ;;  %v158_v62 = vsel %vm67_vm0, %v65_v60, 0.0  ;;  %v161_v63 = vsel %vm67_vm0, %v66_v61, 0.0  ;;  %v196_v0 = vld [vmem:[%s1003_s1] sm:$0xff]  ;;  %v197_v1 = vld [vmem:[%s1003_s1 + $0x8] sm:$0xff]  ;;  %v760_v3 = vmov 0.0|0.0  }
  0x1f   :  { %v673_v2 = vpack.c.bf16 %v197_v1, %v196_v0  ;;  %672 = vmatprep.subr.bf16.mxu0 %v760_v3  ;;  %678 = vmatprep.subr.bf16.mxu1 %v760_v3  ;;  %v198_v4 = vld [vmem:[%s1003_s1 + $0x10] sm:$0xff]  ;;  %v199_v5 = vld [vmem:[%s1003_s1 + $0x18] sm:$0xff]  ;;  %v762_v7 = vmov 0.0   ;;  %v491_v8 = vld [vmem:[%s1005_s3] sm:$0xff]  ;;  %v240_v40 = vand.u32 127, %v239_v37  ;;  %v242_v41 = vshrl.u32 %v239_v37, 7 }
  0x20   :  { %v676_v6 = vpack.c.bf16 %v199_v5, %v198_v4  ;;  %634 = vmatprep.mubr.msk.f32.mxu0 %vm761_vm1, %v762_v7  ;;  %669 = vmatprep.mubr.msk.f32.mxu1 %vm761_vm1, %v762_v7  ;;  %v492_v9 = vld [vmem:[%s1005_s3 + $0x8] sm:$0xff]  ;;  %v493_v10 = vld [vmem:[%s1005_s3 + $0x10] sm:$0xff]  ;;  %v494_v12 = vld [vmem:[%s1005_s3 + $0x18] sm:$0xff]  ;;  %vm257_vm3 = vcmask 195712   ;;  %vm264_vm4 = vcmask 261312   ;;  %vm399_vm5 = vcmask 1041409  }
  0x21   :  { %96 = vadd.xlane.f32.xlu1 %v95_v14  ;;  %674 = vmatpush3.bf16.msra.mxu0 %v673_v2  ;;  %v679_v11 = vpack.c.bf16 %v492_v9, %v491_v8  ;;  %v682_v13 = vpack.c.bf16 %v494_v12, %v493_v10  ;;  %v495_v14 = vld [vmem:[%s1005_s3 + $0x20] sm:$0xff]  ;;  %v497_v17 = vld [vmem:[%s1005_s3 + $0x30] sm:$0xff]  ;;  %v500_v21 = vld [vmem:[%s1005_s3 + $0x48] sm:$0xff]  ;;  %v245_v44 = vadd.s32 4294967288, %v240_v40  ;;  %v252_v45 = vadd.s32 4294967280, %v240_v40 }
  0x22   :  { %93 = vadd.xlane.f32.xlu0 %v92_v15  ;;  %675 = vmatprep.subr.bf16.mxu0 %v760_v3  ;;  %v496_v15 = vld [vmem:[%s1005_s3 + $0x28] sm:$0xff]  ;;  %v499_v20 = vld [vmem:[%s1005_s3 + $0x40] sm:$0xff]  ;;  %vm401_vm6 = vcmask 1042434   ;;  %vm403_vm7 = vcmask 1043459   ;;  %vm405_vm8 = vcmask 1044484   ;;  %vm407_vm9 = vcmask 1045509  }
  0x23   :  { %680 = vmatpush3.bf16.msra.mxu1 %v679_v11  ;;  %v685_v16 = vpack.c.bf16 %v496_v15, %v495_v14  ;;  %vm409_vm10 = vcmask 1046534   ;;  %vm411_vm11 = vcmask 1047559   ;;  %vm413_vm12 = vcmask 261120  }
  0x24   :  { %681 = vmatprep.subr.bf16.mxu1 %v760_v3  ;;  %vm584_vm13 = vcmask 130048  }
  0x25   :  { %90 = vadd.xlane.f32.xlu1 %v89_v18  ;;  %677 = vmatpush3.bf16.msra.mxu0 %v676_v6  ;;  %v498_v18 = vld [vmem:[%s1005_s3 + $0x38] sm:$0xff] }
  0x26   :  { %78 = vadd.xlane.f32.xlu0 %v77_v19  ;;  %v688_v19 = vpack.c.bf16 %v498_v18, %v497_v17 }
  0x27   :  { %683 = vmatpush3.bf16.msra.mxu1 %v682_v13 }
  0x28   :  { %684 = vmatprep.subr.bf16.mxu1 %v760_v3 }
  0x29   :  { %105 = vadd.xlane.f32.xlu1 %v104_v22  ;;  %v691_v22 = vpack.c.bf16 %v500_v21, %v499_v20 }
  0x2a   :  { %99 = vadd.xlane.f32.xlu0 %v98_v23 }
  0x2b   :  { %686 = vmatpush3.bf16.msra.mxu1 %v685_v16 }
  0x2c   :  { %687 = vmatprep.subr.bf16.mxu1 %v760_v3 }
  0x2d   :  { %102 = vadd.xlane.f32.xlu1 %v101_v26 }
  0x2e   :  { %108 = vadd.xlane.f32.xlu0 %v107_v27 }
  0x2f   :  { %689 = vmatpush3.bf16.msra.mxu1 %v688_v19 }
  0x30   :  { %690 = vmatprep.subr.bf16.mxu1 %v760_v3 }
  0x31   :  { %117 = vadd.xlane.f32.xlu1 %v116_v30 }
  0x32   :  { %111 = vadd.xlane.f32.xlu0 %v110_v31 }
  0x33   :  { %692 = vmatpush3.bf16.msra.mxu1 %v691_v22 }
  0x34   :  { %693 = vmatprep.subr.bf16.mxu1 %v760_v3 }
  0x35   :  { %114 = vadd.xlane.f32.xlu1 %v113_v34 }
  0x36   :  { %120 = vadd.xlane.f32.xlu0 %v119_v35 }
  0x39   :  { %129 = vadd.xlane.f32.xlu1 %v128_v38 }
  0x3a   :  { %123 = vadd.xlane.f32.xlu0 %v122_v39 }
  0x3d   :  { %126 = vadd.xlane.f32.xlu1 %v125_v42 }
  0x3e   :  { %132 = vadd.xlane.f32.xlu0 %v131_v43 }
  0x41   :  { %141 = vadd.xlane.f32.xlu1 %v140_v46  ;;  %v259_v46 = vadd.s32 4294967272, %v240_v40 }
  0x42   :  { %135 = vadd.xlane.f32.xlu0 %v134_v47  ;;  %v890_v47 = vsub.s32 %v240_v40, %v242_v41 }
  0x45   :  { %138 = vadd.xlane.f32.xlu1 %v137_v50 }
  0x46   :  { %144 = vadd.xlane.f32.xlu0 %v143_v51  ;;  %v894_v51 = vsub.s32 %v245_v44, %v242_v41 }
  0x49   :  { %153 = vadd.xlane.f32.xlu1 %v152_v54  ;;  %v896_v54 = vsub.s32 %v252_v45, %v242_v41 }
  0x4a   :  { %147 = vadd.xlane.f32.xlu0 %v146_v55 }
  0x4d   :  { %150 = vadd.xlane.f32.xlu1 %v149_v58  ;;  %v898_v58 = vsub.s32 %v259_v46, %v242_v41 }
  0x4e   :  { %156 = vadd.xlane.f32.xlu0 %v155_v59 }
  0x51   :  { %162 = vadd.xlane.f32.xlu1 %v161_v63 }
  0x52   :  { %159 = vadd.xlane.f32.xlu0 %v158_v62 }
  0xa2   :  { %v82_v23 = vpop.xlane.xlu1 %81 }
  0xa3   :  { %v70_v24 = vpop.xlane.xlu0 %69  ;;  %v168_v50 = vmul.f32 0.015625, %v82_v23 }
  0xa4   :  { %v164_v57 = vmul.f32 0.015625, %v70_v24 }
  0xa5   :  { %v269_v63 = vrot.slane %v168_v50, %v890_v47 }
  0xa6   :  { %v85_v25 = vpop.xlane.xlu1 %84  ;;  %v244_v7 = vrot.slane %v164_v57, %v890_v47 }
  0xa7   :  { %v73_v26 = vpop.xlane.xlu0 %72  ;;  %v169_v52 = vmul.f32 0.015625, %v85_v25 }
  0xa8   :  { %v165_v53 = vmul.f32 0.015625, %v73_v26 }
  0xa9   :  { %v273_v0 = vrot.slane %v169_v52, %v894_v51 }
  0xaa   :  { %v88_v27 = vpop.xlane.xlu1 %87  ;;  %v249_v1 = vrot.slane %v165_v53, %v894_v51 }
  0xab   :  { %v76_v28 = vpop.xlane.xlu0 %75  ;;  %v170_v55 = vmul.f32 0.015625, %v88_v27  ;;  %v274_v13 = vsel %vm250_vm2, %v273_v0, %v269_v63 }
  0xac   :  { %v166_v56 = vmul.f32 0.015625, %v76_v28  ;;  %v251_v14 = vsel %vm250_vm2, %v249_v1, %v244_v7 }
  0xad   :  { %v278_v2 = vrot.slane %v170_v55, %v896_v54 }
  0xae   :  { %v97_v29 = vpop.xlane.xlu1 %96  ;;  %v256_v4 = vrot.slane %v166_v56, %v896_v54 }
  0xaf   :  { %v94_v30 = vpop.xlane.xlu0 %93  ;;  %v173_v5 = vmul.f32 0.015625, %v97_v29  ;;  %v279_v16 = vsel %vm257_vm3, %v278_v2, %v274_v13 }
  0xb0   :  { %v172_v6 = vmul.f32 0.015625, %v94_v30  ;;  %v258_v17 = vsel %vm257_vm3, %v256_v4, %v251_v14 }
  0xb1   :  { %v292_v18 = vrot.slane %v173_v5, %v894_v51 }
  0xb2   :  { %v91_v31 = vpop.xlane.xlu1 %90  ;;  %v288_v19 = vrot.slane %v172_v6, %v890_v47 }
  0xb3   :  { %v79_v32 = vpop.xlane.xlu0 %78  ;;  %v171_v59 = vmul.f32 0.015625, %v91_v31 }
  0xb4   :  { %v167_v60 = vmul.f32 0.015625, %v79_v32  ;;  %v293_v29 = vsel %vm250_vm2, %v292_v18, %v288_v19 }
  0xb5   :  { %v283_v8 = vrot.slane %v171_v59, %v898_v58 }
  0xb6   :  { %v106_v33 = vpop.xlane.xlu1 %105  ;;  %v263_v9 = vrot.slane %v167_v60, %v898_v58 }
  0xb7   :  { %v100_v34 = vpop.xlane.xlu0 %99  ;;  %v284_v20 = vsel %vm264_vm4, %v283_v8, %v279_v16  ;;  %v176_v27 = vmul.f32 0.015625, %v106_v33 }
  0xb8   :  { %v174_v10 = vmul.f32 0.015625, %v100_v34  ;;  %v265_v21 = vsel %vm264_vm4, %v263_v9, %v258_v17 }
  0xb9   :  { %v400_v30 = vsel %vm399_vm5, %v284_v20, %v265_v21  ;;  %v307_v45 = vrot.slane %v176_v27, %v890_v47 }
  0xba   :  { %v103_v35 = vpop.xlane.xlu1 %102  ;;  %v297_v22 = vrot.slane %v174_v10, %v896_v54 }
  0xbb   :  { %v109_v36 = vpop.xlane.xlu0 %108  ;;  %v175_v15 = vmul.f32 0.015625, %v103_v35 }
  0xbc   :  { %v177_v23 = vmul.f32 0.015625, %v109_v36  ;;  %v298_v32 = vsel %vm257_vm3, %v297_v22, %v293_v29 }
  0xbd   :  { %v302_v28 = vrot.slane %v175_v15, %v898_v58 }
  0xbe   :  { %v118_v38 = vpop.xlane.xlu1 %117  ;;  %v311_v34 = vrot.slane %v177_v23, %v894_v51 }
  0xbf   :  { %v888_v39 = vpop.xlane.xlu0 %111  ;;  %v180_v31 = vmul.f32 0.015625, %v118_v38  ;;  %v303_v38 = vsel %vm264_vm4, %v302_v28, %v298_v32 }
  0xc0   :  { %v178_v35 = vmul.f32 0.015625, %v888_v39  ;;  %v402_v23 = vsel %vm401_vm6, %v303_v38, %v400_v30  ;;  %v601_v38 = vld [vmem:[%s1004_s2] ss:$0 sm:$0xff] }
  0xc1   :  { %v326_v52 = vrot.slane %v180_v31, %v890_v47 }
  0xc2   :  { %v115_v42 = vpop.xlane.xlu1 %114  ;;  %v316_v55 = vrot.slane %v178_v35, %v896_v54 }
  0xc3   :  { %v121_v43 = vpop.xlane.xlu0 %120  ;;  %v179_v36 = vmul.f32 0.015625, %v115_v42  ;;  %v312_v42 = vsel %vm250_vm2, %v311_v34, %v307_v45 }
  0xc4   :  { %v181_v24 = vmul.f32 0.015625, %v121_v43  ;;  %v317_v9 = vsel %vm257_vm3, %v316_v55, %v312_v42  ;;  %v603_v55 = vld [vmem:[%s1006_s4] ss:$0 sm:$0xff] }
  0xc5   :  { %v321_v59 = vrot.slane %v179_v36, %v898_v58 }
  0xc6   :  { %v892_v48 = vpop.xlane.xlu1 %129  ;;  %v330_v40 = vrot.slane %v181_v24, %v894_v51 }
  0xc7   :  { %v124_v49 = vpop.xlane.xlu0 %123  ;;  %v184_v39 = vmul.f32 0.015625, %v892_v48  ;;  %v322_v13 = vsel %vm264_vm4, %v321_v59, %v317_v9 }
  0xc8   :  { %v182_v37 = vmul.f32 0.015625, %v124_v49  ;;  %v331_v60 = vsel %vm250_vm2, %v330_v40, %v326_v52  ;;  %v404_v27 = vsel %vm403_vm7, %v322_v13, %v402_v23  ;;  %v503_v40 = vld [vmem:[%s1005_s3 + $0x60] sm:$0xff] }
  0xc9   :  { %v345_v5 = vrot.slane %v184_v39, %v890_v47 }
  0xca   :  { %v127_v61 = vpop.xlane.xlu1 %126  ;;  %v335_v56 = vrot.slane %v182_v37, %v896_v54 }
  0xcb   :  { %v133_v62 = vpop.xlane.xlu0 %132  ;;  %v183_v33 = vmul.f32 0.015625, %v127_v61 }
  0xcc   :  { %v185_v41 = vmul.f32 0.015625, %v133_v62  ;;  %v336_v10 = vsel %vm257_vm3, %v335_v56, %v331_v60 }
  0xcd   :  { %v340_v61 = vrot.slane %v183_v33, %v898_v58  ;;  %v504_v33 = vld [vmem:[%s1005_s3 + $0x68] sm:$0xff] }
  0xce   :  { %v142_v11 = vpop.xlane.xlu1 %141  ;;  %v349_v62 = vrot.slane %v185_v41, %v894_v51  ;;  %v697_v41 = vpack.c.bf16 %v504_v33, %v503_v40 }
  0xcf   :  { %v136_v12 = vpop.xlane.xlu0 %135  ;;  %v188_v57 = vmul.f32 0.015625, %v142_v11  ;;  %v341_v14 = vsel %vm264_vm4, %v340_v61, %v336_v10 }
  0xd0   :  { %v186_v46 = vmul.f32 0.015625, %v136_v12  ;;  %v350_v15 = vsel %vm250_vm2, %v349_v62, %v345_v5  ;;  %v406_v31 = vsel %vm405_vm8, %v341_v14, %v404_v27 }
  0xd1   :  { %v364_v11 = vrot.slane %v188_v57, %v890_v47 }
  0xd2   :  { %v139_v25 = vpop.xlane.xlu1 %138  ;;  %v354_v0 = vrot.slane %v186_v46, %v896_v54 }
  0xd3   :  { %v145_v26 = vpop.xlane.xlu0 %144  ;;  %v187_v49 = vmul.f32 0.015625, %v139_v25 }
  0xd4   :  { %v189_v50 = vmul.f32 0.015625, %v145_v26  ;;  %v355_v19 = vsel %vm257_vm3, %v354_v0, %v350_v15 }
  0xd5   :  { %v359_v6 = vrot.slane %v187_v49, %v898_v58 }
  0xd6   :  { %v154_v43 = vpop.xlane.xlu1 %153  ;;  %v368_v1 = vrot.slane %v189_v50, %v894_v51 }
  0xd7   :  { %v148_v44 = vpop.xlane.xlu0 %147  ;;  %v192_v7 = vmul.f32 0.015625, %v154_v43  ;;  %v360_v24 = vsel %vm264_vm4, %v359_v6, %v355_v19  ;;  %v505_v43 = vld [vmem:[%s1005_s3 + $0x70] sm:$0xff] }
  0xd8   :  { %v190_v53 = vmul.f32 0.015625, %v148_v44  ;;  %v369_v20 = vsel %vm250_vm2, %v368_v1, %v364_v11  ;;  %v408_v34 = vsel %vm407_vm9, %v360_v24, %v406_v31  ;;  %v506_v44 = vld [vmem:[%s1005_s3 + $0x78] sm:$0xff] }
  0xd9   :  { %v383_v25 = vrot.slane %v192_v7, %v890_v47  ;;  %v700_v45 = vpack.c.bf16 %v506_v44, %v505_v43 }
  0xda   :  { %v151_v48 = vpop.xlane.xlu1 %150  ;;  %v373_v8 = vrot.slane %v190_v53, %v896_v54 }
  0xdb   :  { %v157_v63 = vpop.xlane.xlu0 %156  ;;  %v191_v2 = vmul.f32 0.015625, %v151_v48 }
  0xdc   :  { %v193_v4 = vmul.f32 0.015625, %v157_v63  ;;  %v374_v26 = vsel %vm257_vm3, %v373_v8, %v369_v20 }
  0xdd   :  { %v378_v12 = vrot.slane %v191_v2, %v898_v58 }
  0xde   :  { %v387_v16 = vrot.slane %v193_v4, %v894_v51  ;;  %v163_v18 = vpop.xlane.xlu1 %162 }
  0xdf   :  { %v160_v17 = vpop.xlane.xlu0 %159  ;;  %v195_v22 = vmul.f32 0.015625, %v163_v18  ;;  %v379_v51 = vsel %vm264_vm4, %v378_v12, %v374_v26 }
  0xe0   :  { %v194_v21 = vmul.f32 0.015625, %v160_v17  ;;  %v388_v32 = vsel %vm250_vm2, %v387_v16, %v383_v25  ;;  %v410_v35 = vsel %vm409_vm10, %v379_v51, %v408_v34 }
  0xe1   :  { %v397_v29 = vrot.slane %v195_v22, %v898_v58  ;;  %v502_v58 = vld [vmem:[%s1005_s3 + $0x58] sm:$0xff] }
  0xe2   :  { %v392_v28 = vrot.slane %v194_v21, %v896_v54  ;;  %v501_v54 = vld [vmem:[%s1005_s3 + $0x50] sm:$0xff]  ;;  %s763_s3 = smov [#allocation5]  }
  0xe3   :  { %v694_v36 = vpack.c.bf16 %v502_v58, %v501_v54  ;;  %s592_s22 = sshll.u32 %s763_s3, 4  ;;  %s593_s22 = int_to_ptr.vmem [resolvable:$true] %s592_s22 }
  0xe4   :  { %v393_v30 = vsel %vm257_vm3, %v392_v28, %v388_v32  ;;  %s731_s2 = scalar_lea.vmem %s593_s22, 128  ;;  %p736_p9 = scmp.lt.s32.totalorder %s593_s22, %s593_s22 }
  0xe5   :  { %v398_v47 = vsel %vm264_vm4, %v397_v29, %v393_v30  ;;  %695 = vmatpush3.bf16.msra.mxu1 %v694_v36  ;;  %p732_p8 = scmp.ne.s32.totalorder %s593_s22, %s731_s2  ;;  %p737_p10 = scmp.lt.s32.totalorder %s731_s2, %s731_s2 }
  0xe6   :  { %v412_v37 = vsel %vm411_vm11, %v398_v47, %v410_v35  ;;  %696 = vmatprep.subr.bf16.mxu1 %v760_v3 }
  0xe7   :  { %635 = vmatmul.mubr.msk.f32.vlgmr.msra.gmra.mrb[0].mxu0 %vm413_vm12, %v412_v37  ;;  %p738_p11 = por %p737_p10, %p736_p9 }
  0xe9   :  { %698 = vmatpush3.bf16.msra.mxu1 %v697_v41  ;;  %p739_p12 = pnand %p738_p11, %p732_p8 }
  0xea   :  { %699 = vmatprep.subr.bf16.mxu1 %v760_v3 }
  0xed   :  { %701 = vmatpush3.bf16.msra.mxu1 %v700_v45 }
 0x1ba   :  { %v482_v46 = vpop.f32.mrb[0].mxu0 }
 0x1bb   :  { %v483_v50 = vadd.f32 %v601_v38, %v482_v46  ;;  %v636_v52 = vpop.f32.mrb[1].mxu0 }
 0x1bd   :  { %v486_v39 = vadd.f32 3.0, %v483_v50 }
 0x1bf   :  { %v487_v49 = vmax.f32 %v486_v39, 0.0 }
 0x1c1   :  { %v488_v3 = vmin.f32 %v487_v49, 6.0 }
 0x1c3   :  { %v489_v53 = vmul.f32 %v488_v3, %v483_v50 }
 0x1c5   :  { %v490_v42 = vmul.f32 0.16666667, %v489_v53 }
 0x1c7   :  { %670 = vmatmul.mubr.f32.vlgmr.msra.gmra.mrb[0].mxu1 %v490_v42 }
 0x29a   :  { %v580_v56 = vpop.f32.mrb[0].mxu1 }
 0x29b   :  { %v581_v57 = vadd.f32 %v603_v55, %v580_v56  ;;  %v671_v59 = vpop.f32.mrb[1].mxu1 }
 0x29d   :  { %585 = vst.msk [vmem:[#allocation5] sm:$0xff] %vm584_vm13, %v581_v57 }
 0x29e   :  { %742 = shalt.err (!%p739_p12)
}
 0x29f   :  { %s743_s25 = scalar_lea.hbm %s1007_s5, 128 }
 0x2a0   :  { %p744_p13 = scmp.ne.s32.totalorder %s1007_s5, %s743_s25  ;;  %p747_p0 = scmp.lt.u32.totalorder %s743_s25, %s1007_s5 }
 0x2a2   :  { %p749_p1 = pnand %p747_p0, %p744_p13 }
 0x2a4   :  { %752 = shalt.err (!%p749_p1)
}
 0x2a5   :  { %595 = dma.vmem_to_hbm [thread:$0]  %s593_s22, 128, %s1007_s5, [#allocation4]  }
 0x2a6   :  { %755 = dma.done.wait [#allocation4], 128  }
 0x2a7   :  { %756 = vsyncadd [#allocation4], 4294967168 }
 0x2a8   :  { %599 = vsyncpa [#allocation3], 1 }
 0x2a9   :  { %600 = vsyncpa [#allocation4], 1 }

</bundles_post_ra>
